<compile_context>
chip_gen: v5e
topology: v5e:2x2
jax: 0.10.0
libtpu: 0.0.40
codegen_flags: <defaults>
</compile_context>

<pallas_src>
import math

import jax
import jax.numpy as jnp
from jax.experimental import pallas as pl
from jax.experimental.pallas import tpu as pltpu


def _round_up(x, m):
    return (x + m - 1) // m * m


def _sampler_kernel(coef_ref, od_ref, out_ref):
    """One grid step processes a tile of grouped ray-rows.

    coef_ref : (6G, 3PG) constant block-diagonal coefficient table (f32)
    od_ref   : (T, 6G)   fused [origin, direction] for G rays per row
    out_ref  : (T, 3PG)  lane-dense sample points; row-major == (T*G, P, 3)
    """
    od = od_ref[...].astype(jnp.float32)
    out = jnp.dot(
        od, coef_ref[...],
        preferred_element_type=jnp.float32,
        precision=jax.lax.Precision.HIGHEST,   # exact f32 pass-through of origins
    )
    out_ref[...] = out.astype(out_ref.dtype)


def _choose_tile_rows(n_rows, in_w, out_w, itemsize, granule,
                      vmem_budget_bytes, coef_bytes):
    """Largest grouped-row tile whose double-buffered, lane-padded footprint fits."""
    bytes_per_row = (2 * _round_up(out_w, 128) * itemsize      # output, 2 buffers
                     + 2 * _round_up(in_w, 128) * itemsize)    # fused input, 2 buffers
    budget = max(vmem_budget_bytes - coef_bytes, 1 << 20)
    t = budget // max(bytes_per_row, 1)
    t = max(granule, (t // granule) * granule)
    if t >= n_rows:
        # Whole problem fits in one step; keep >=2 steps when possible so the
        # single "parallel" axis can be sharded across both TCs on v7x.
        if n_rows >= 2 * granule:
            t = _round_up(-(-n_rows // 2), granule)
        else:
            t = n_rows
    return min(t, n_rows)


def stratified_raysampler(origins, directions, *, n_pts_per_ray,
                          min_depth, max_depth, tile_rows=None,
                          vmem_budget_bytes=24 * 1024 * 1024):
    """Pallas-backed StratifiedRaysampler.forward.

    Returns a dict standing in for RayBundle(origins, directions,
    sample_points, sample_lengths).
    """
    N, C = origins.shape
    assert C == 3 and directions.shape == (N, 3)
    P = int(n_pts_per_ray)
    W = 3 * P
    dtype = origins.dtype
    itemsize = jnp.dtype(dtype).itemsize
    granule = max(8, 32 // itemsize)          # sublane granule: 8 f32 / 16 bf16 / 32 int8

    # Ray-grouping factor: smallest G with (G*W) % 128 == 0 (100% lane utilization).
    G = (W * 128 // math.gcd(W, 128)) // W
    # Guard the block-diagonal coefficient table size for pathological W only.
    while G > 1 and 6 * G * W * G * 4 > (8 << 20):
        G //= 2
    WG = W * G
    IN_W = 6 * G

    # z values (torch.linspace semantics, endpoint inclusive).
    z = jnp.linspace(float(min_depth), float(max_depth), P, dtype=jnp.float32)   # (P,)
    eye3 = jnp.eye(3, dtype=jnp.float32)
    E = jnp.tile(eye3, (1, P))                          # (3, W): E[c, 3p+c'] = (c==c')
    ZE = E * jnp.repeat(z, 3)[None, :]                  # (3, W): z[p] on matching lanes
    coef1 = jnp.concatenate([E, ZE], axis=0)            # (6, W)
    coef = jnp.kron(jnp.eye(G, dtype=jnp.float32), coef1)   # (6G, WG) block-diagonal

    # Fuse origins+directions into one small (N, 6) input, then group G rays/row.
    od = jnp.concatenate([origins, directions], axis=1)      # (N, 6)  (cheap)
    N_g = -(-N // G)
    N_pad = N_g * G
    if N_pad != N:
        od = jnp.pad(od, ((0, N_pad - N), (0, 0)))           # pads only <G rays of input
    od_g = od.reshape(N_g, IN_W)

    coef_bytes = 2 * _round_up(6 * G, 8) * _round_up(WG, 128) * 4
    if tile_rows is None:
        tile_rows = _choose_tile_rows(N_g, IN_W, WG, itemsize, granule,
                                      vmem_budget_bytes, coef_bytes)
    else:
        tile_rows = min(int(tile_rows), N_g)
        if tile_rows < N_g:
            tile_rows = max(granule, (tile_rows // granule) * granule)

    grid = (pl.cdiv(N_g, tile_rows),)   # boundary blocks OK: kernel is row-independent

    flat = pl.pallas_call(
        _sampler_kernel,
        out_shape=jax.ShapeDtypeStruct((N_g, WG), dtype),
        grid=grid,
        in_specs=[
            pl.BlockSpec((6 * G, WG), lambda i: (0, 0)),        # constant, stays resident
            pl.BlockSpec((tile_rows, IN_W), lambda i: (i, 0)),  # fused origins+directions
        ],
        out_specs=pl.BlockSpec((tile_rows, WG), lambda i: (i, 0)),
        # NOTE: if profiling shows exposed output writeback, sweep
        # pipeline_mode=pl.Buffered(3) on out_specs (cheap after lane-density fix).
        compiler_params=pltpu.CompilerParams(
            dimension_semantics=("parallel",),
            vmem_limit_bytes=48 * 1024 * 1024,
        ),
    )(coef, od_g)

    # Free row-major reshape back; the slice only exists when N % G != 0.
    pts = flat.reshape(N_pad, P, 3)
    sample_points = pts if N_pad == N else pts[:N]

    # sample_lengths is input-independent -> pure broadcast in the wrapper.
    sample_lengths = jnp.broadcast_to(z.astype(dtype)[None, :, None], (N, P, 1))

    # TODO(synk): RayBundle container from the original codebase is returned as a dict.
    return {
        "origins": origins,
        "directions": directions,
        "sample_points": sample_points,
        "sample_lengths": sample_lengths,
    }


def _reference(origins, directions, n_pts, min_depth, max_depth):
    z = jnp.linspace(min_depth, max_depth, n_pts,
                     dtype=jnp.float32)[None, :, None]            # (1, P, 1)
    pts = origins[:, None, :] + directions[:, None, :] * z        # (N, P, 3)
    lens = z * jnp.ones_like(pts[..., :1])                        # (N, P, 1)
    return pts.astype(origins.dtype), lens.astype(origins.dtype)


if __name__ == "__main__":
    # cfg: n_pts_per_ray=8, min_depth=0.1, max_depth=5.0
    N_PTS, MIN_D, MAX_D = 8, 0.1, 5.0

    key = jax.random.PRNGKey(0)
    # 256 rays: multiple of G=16 -> fully lane-dense path, no post-slice, 2 grid steps.
    # 100 rays: ragged -> exercises the tiny input pad + output slice fallback.
    for n_rays in (256, 100):
        key, k_o, k_d = jax.random.split(key, 3)
        origins = jax.random.normal(k_o, (n_rays, 3), dtype=jnp.float32)
        directions = jax.random.normal(k_d, (n_rays, 3), dtype=jnp.float32)
        directions = directions / jnp.linalg.norm(directions, axis=-1, keepdims=True)

        out = stratified_raysampler(
            origins, directions,
            n_pts_per_ray=N_PTS, min_depth=MIN_D, max_depth=MAX_D)
        jax.block_until_ready(out["sample_points"])
        jax.block_until_ready(out["sample_lengths"])

        ref_pts, ref_lens = _reference(origins, directions, N_PTS, MIN_D, MAX_D)
        assert out["sample_points"].shape == (n_rays, N_PTS, 3)
        assert out["sample_lengths"].shape == (n_rays, N_PTS, 1)
        assert jnp.allclose(out["sample_points"], ref_pts, atol=1e-5, rtol=1e-5)
        assert jnp.allclose(out["sample_lengths"], ref_lens, atol=1e-5, rtol=1e-5)

    print("KERNEL_OK")
</pallas_src>

<mosaic_0001>
module attributes {stable_mosaic.version = 11 : i64} {
  func.func @_sampler_kernel(%arg0: i32, %arg1: memref<96x384xf32, #tpu.memory_space<vmem>>, %arg2: memref<8x96xf32, #tpu.memory_space<vmem>>, %arg3: memref<8x384xf32, #tpu.memory_space<vmem>>) attributes {dimension_semantics = [#tpu.dimension_semantics<parallel>], iteration_bounds = array<i64: 2>, scalar_prefetch = 0 : i64, scratch_operands = 0 : i64, tpu.core_type = #tpu.core_type<tc>, window_params = [{pipeline_mode = #tpu.pipeline_mode<synchronous>, transform_indices = @transform_0, window_bounds = array<i64: 96, 384>}, {transform_indices = @transform_1, window_bounds = array<i64: 8, 96>}, {transform_indices = @transform_2, window_bounds = array<i64: 8, 384>}]} {
    %c0 = arith.constant 0 : index
    %c0_0 = arith.constant 0 : index
    %0 = vector.load %arg2[%c0, %c0_0] : memref<8x96xf32, #tpu.memory_space<vmem>>, vector<8x96xf32>
    %c0_1 = arith.constant 0 : index
    %c0_2 = arith.constant 0 : index
    %1 = vector.load %arg1[%c0_1, %c0_2] : memref<96x384xf32, #tpu.memory_space<vmem>>, vector<96x384xf32>
    %cst = arith.constant dense<0.000000e+00> : vector<8x384xf32>
    %2 = tpu.matmul %0, %1, %cst {dimension_numbers = #tpu.dot_dimension_numbers<[1], [0], [0], [1], [0, 0, 1, 1], [], []>, precision = #tpu.contract_precision<fp32>} : vector<8x96xf32>, vector<96x384xf32>, vector<8x384xf32> -> vector<8x384xf32>
    %c0_3 = arith.constant 0 : index
    %c0_4 = arith.constant 0 : index
    %3 = vector.load %arg3[%c0_3, %c0_4] : memref<8x384xf32, #tpu.memory_space<vmem>>, vector<8x384xf32>
    tpu.vector_store %arg3[%c0_3, %c0_4], %2 {strides = array<i32>} : memref<8x384xf32, #tpu.memory_space<vmem>>, vector<8x384xf32>,
    return
  }
  func.func @transform_0(%arg0: i32) -> (i32, i32) {
    %c0_i32 = arith.constant 0 : i32
    %c0_i32_0 = arith.constant 0 : i32
    %c0_i32_1 = arith.constant 0 : i32
    return %c0_i32, %c0_i32_0 : i32, i32
  }
  func.func @transform_1(%arg0: i32) -> (i32, i32) {
    %c0_i32 = arith.constant 0 : i32
    %c0_i32_0 = arith.constant 0 : i32
    return %arg0, %c0_i32 : i32, i32
  }
  func.func @transform_2(%arg0: i32) -> (i32, i32) {
    %c0_i32 = arith.constant 0 : i32
    %c0_i32_0 = arith.constant 0 : i32
    return %arg0, %c0_i32 : i32, i32
  }
}

</mosaic_0001>

<bundles_post_ra>
// kernel: tpu_custom_call.1
= control target key start
LH: loop header
LB: loop body
LE: loop exit
PB: predicated region body
PF: predicated region fallthrough
CT: control target
= control target key end

     0   :  { %7 = vsyncpa [#allocation3], 0  ;;  %s2127_s0 = inlined_call_operand.hbm [shape: f32[96,384], index: 0, kind: input, shape index: {}]   ;;  %s2128_s1 = inlined_call_operand.hbm [shape: f32[16,96], index: 1, kind: input, shape index: {}]   ;;  %s2129_s2 = inlined_call_operand.hbm [shape: f32[16,384], index: 2, kind: output, shape index: {}]  }
   0x1   :  { %8 = vsyncpa [#allocation6], 0 }
   0x2   :  { %10 = vsyncpa [#allocation6 + $0x1], 0 }
   0x3   :  { %11 = vsyncpa [#allocation4], 0 }
   0x4   :  { %13 = vsyncpa [#allocation4 + $0x1], 0  ;;  %s1411_s9 = smov 0   ;;  %s1413_s10 = smov 0  }
   0x5   :  { %s1415_s11 = smov 0   ;;  %s1417_s12 = smov 0  }
   0x6 LB: > { %s108_s15 = sshll.u32 %s2127_s0, 4  ;;  %s1435_s16 = sadd.s32 4294967295, %s1391_s12   ;;  %s1391_s12 = sphi %s1417_s12, %s2145_s12   ;;  %s1387_s11 = sphi %s1415_s11, %s2144_s11   ;;  %s1383_s10 = sphi %s1413_s10, %s2143_s10   ;;  %s1379_s9 = sphi %s1411_s9, %s2142_s9   ;;  %s109_s15 = int_to_ptr.hbm [resolvable:$true] %s108_s15 }
   0x7   : > { %p1189_p0 = scmp.ge.s32.totalorder %s1391_s12, 1  ;;  %p61_p1 = scmp.eq.s32.totalorder %s1435_s16, 0 }
   0x8   : > { %p97_p2 = scmp.lt.s32.totalorder %s1391_s12, 3  ;;  %s1393_s18 = smov [#allocation2]  }
   0x9   : > { %s110_s19 = sshll.u32 %s1393_s18, 4  ;;  %s1394_s20 = smov 384   ;;  %s111_s19 = int_to_ptr.vmem [resolvable:$true] %s110_s19 }
   0xa   : > { %p1440_p3 = pnand %p1189_p0, %p97_p2  ;;  %s1395_s21 = smov 24  }
   0xb   : > { %s1188_s22 = sadd.s32 4294967294, %s1391_s12   ;;  %s1451_s23 = sadd.s32 1, %s1391_s12  }
   0xc   : > { %p1210_p4 = pneg %p1440_p3  ;;  %s47_s24 = sadd.s32 1, %s1387_s11 }
   0xd   : > { %s44_s25 = ssub.s32 %s1391_s12, %s1451_s23  ;;  %p54_p7 = scmp.ne.s32.totalorder %s1387_s11, %s1383_s10 }
   0xe   : > { %p1211_p6 = pnand %p1210_p4, %p61_p1  ;;  %p45_p8 = scmp.eq.s32.totalorder %s44_s25, 0 }
   0xf   : > { %p55_p9 = scmp.eq.s32.totalorder %s1391_s12, 0  ;;  %p60_p10 = scmp.ne.s32.totalorder %s1383_s10, %s1379_s9 }
  0x10   : > { %1213 = dma.hbm_to_vmem [thread:$0]  (!%p1211_p6), %s109_s15, 4608, %s111_s19, [#allocation3], %s1394_s20, %s1394_s20, %s1395_s21  }
  0x11   : > { %p84_p11 = scmp.eq.s32.totalorder %s1435_s16, 1  ;;  %p1467_p12 = por %p61_p1, %p60_p10 }
  0x12   : > { %s1463_s26 = scalar_select %p45_p8, %s1387_s11, %s47_s24  }
  0x13   : > { %p1471_p13 = por %p84_p11, %p54_p7  ;;  %p90_p0 = scmp.eq.s32.totalorder %s1188_s22, 1 }
  0x14   : > { %p56_p2 = por %p55_p9, %p54_p7  ;;  %s124_s29 = sand.u32 1, %s1387_s11  }
  0x15   : > { %p1476_p4 = por %p90_p0, %p60_p10  ;;  %p1223_p6 = scmp.lt.s32.totalorder %s1391_s12, 2 }
  0x16   : > { %s1192_s3 = sshll.u32 %s124_s29, 3  ;;  %s1193_s4 = sshll.u32 %s1391_s12, 3 }
  0x17   : > { %s132_s7 = scalar_lea.hbm %s2128_s1, %s1193_s4  ;;  %s128_s13 = scalar_lea.vmem [#allocation5], %s1192_s3 }
  0x18   : > { %s134_s8 = sshll.u32 %s132_s7, 4  ;;  %s136_s14 = sshll.u32 %s128_s13, 4  ;;  %s135_s8 = int_to_ptr.hbm [resolvable:$true] %s134_s8  ;;  %s137_s14 = int_to_ptr.vmem [resolvable:$true] %s136_s14 }
  0x19   : > { %p1485_p8 = pnand %p1223_p6, %p56_p2  ;;  %s125_s18 = scalar_lea.sflag [#allocation6], %s124_s29 }
  0x1a   : > { %s1291_s19 = sshra.s32 %s135_s8, 4  ;;  %s1298_s24 = scalar_lea.hbm %s2128_s1, 16  ;;  %s1292_s19 = int_to_ptr.hbm [resolvable:$true] %s1291_s19 }
  0x1b   : > { %s1293_s20 = scalar_lea.hbm %s1292_s19, 8  ;;  %p1295_p9 = pneg %p1485_p8 }
  0x1c   : > { %p1294_p7 = scmp.ne.s32.totalorder %s1292_s19, %s1293_s20  ;;  %p1299_p0 = scmp.lt.s32.totalorder %s1292_s19, %s2128_s1 }
  0x1d   : > { %p1300_p2 = scmp.lt.s32.totalorder %s1298_s24, %s1293_s20 }
  0x1e   : > { %p1296_p10 = pnand %p1295_p9, %p1294_p7 }
  0x1f   : > { %p1301_p6 = por %p1300_p2, %p1299_p0 }
  0x20   : > { %p1297_p11 = pneg %p1296_p10 }
  0x22   : > { %p1302_p5 = pnand %p1301_p6, %p1297_p11 }
  0x24   : > { %1305 = shalt.err (!%p1302_p5)
}
  0x25   : > { %1217 = dma.hbm_to_vmem [thread:$0]  (!%p1485_p8), %s135_s8, 128, %s137_s14, %s125_s18  }
  0x26   : > { %145 = sbr.rel (%p1440_p3) target bundleno = 309 (0x135), region = 28 }
  0x2b   : > { %1366 = dma.done.wait (%p61_p1), [#allocation3], 4608  }
  0x2c   : > { %1368 = vsyncadd (%p61_p1), [#allocation3], 4294962688  ;;  %s1506_s29 = sand.u32 1, %s1383_s10  }
  0x2d   : > { %s1196_s4 = sshll.u32 %s1506_s29, 3  ;;  %s153_s5 = scalar_lea.sflag [#allocation6], %s1506_s29 }
  0x2e   : > { %s1510_s6 = scalar_lea.vmem [#allocation5], %s1196_s4 }
  0x2f   : > { %1370 = dma.done.wait (%p1467_p12), %s153_s5, 128  }
  0x30   : > { %1372 = vsyncadd (%p1467_p12), %s153_s5, 4294967168  ;;  %v212_v0 = vld [vmem:[#allocation2 + $0x108] sm:$0xff]  ;;  %v209_v1 = vld [vmem:[#allocation2 + $0xf0] sm:$0xff]  ;;  %vm215_vm0 = vcmask 785408   ;;  %s1200_s17 = smul.u32 24, %s1506_s29  ;;  %s1090_s19 = scalar_lea.sflag [#allocation4], %s1506_s29 }
  0x31   : > { %v206_v2 = vld [vmem:[#allocation2 + $0xd8] sm:$0xff]  ;;  %v1516_v3 = vand.u32 4294901760, %v212_v0  ;;  %v1518_v4 = vand.u32 4294901760, %v209_v1  ;;  %v203_v6 = vld [vmem:[#allocation2 + $0xc0] sm:$0xff]  ;;  %v200_v7 = vld [vmem:[#allocation2 + $0xa8] sm:$0xff]  ;;  %s1201_s7 = smul.u32 24, %s1435_s16 }
  0x32   : > { %v1520_v5 = vand.u32 4294901760, %v206_v2  ;;  %v197_v8 = vld [vmem:[#allocation2 + $0x90] sm:$0xff]  ;;  %v1522_v9 = vand.u32 4294901760, %v203_v6  ;;  %v1524_v10 = vand.u32 4294901760, %v200_v7  ;;  %v194_v12 = vld [vmem:[#allocation2 + $0x78] sm:$0xff]  ;;  %v191_v13 = vld [vmem:[#allocation2 + $0x60] sm:$0xff] }
  0x33   : > { %v1526_v11 = vand.u32 4294901760, %v197_v8  ;;  %224 = vmatpush.msra.mxu0 %v1516_v3  ;;  %v1530_v14 = vsub.f32 %v212_v0, %v1516_v3  ;;  %v1533_v15 = vsub.f32 %v209_v1, %v1518_v4  ;;  %v1538_v17 = vand.u32 4294901760, %v194_v12  ;;  %388 = vmatpush.msra.mxu3 %v1516_v3  ;;  %v188_v21 = vld [vmem:[#allocation2 + $0x48] sm:$0xff]  ;;  %v185_v26 = vld [vmem:[#allocation2 + $0x30] sm:$0xff]  ;;  %v182_v36 = vld [vmem:[#allocation2 + $0x18] sm:$0xff]  ;;  %s2088_s27 = scalar_lea.vmem [#allocation7], %s1200_s17  ;;  %s1101_s14 = scalar_lea.hbm %s2129_s2, %s1201_s7 }
  0x34   : > { %v1536_v16 = vsub.f32 %v206_v2, %v1520_v5  ;;  %v1542_v18 = vsub.f32 %v203_v6, %v1522_v9  ;;  %v1545_v19 = vsub.f32 %v200_v7, %v1524_v10  ;;  %v1555_v25 = vand.u32 4294901760, %v191_v13  ;;  %v213_v41 = vld [vmem:[#allocation2 + $0x110] sm:$0xff]  ;;  %v210_v42 = vld [vmem:[#allocation2 + $0xf8] sm:$0xff]  ;;  %v179_v44 = vld [vmem:[#allocation2] sm:$0xff]  ;;  %s1103_s15 = sshll.u32 %s2088_s27, 4  ;;  %s1105_s18 = sshll.u32 %s1101_s14, 4  ;;  %s1104_s15 = int_to_ptr.vmem [resolvable:$true] %s1103_s15  ;;  %s1106_s18 = int_to_ptr.hbm [resolvable:$true] %s1105_s18 }
  0x35   : > { %v1548_v20 = vsub.f32 %v197_v8, %v1526_v11  ;;  %226 = vmatpush.msra.mxu0 %v1518_v4  ;;  %v262_v22 = vand.u32 4294901760, %v1530_v14  ;;  %v268_v23 = vand.u32 4294901760, %v1533_v15  ;;  %343 = vmatpush.msra.mxu2 %v1530_v14  ;;  %v1560_v29 = vsub.f32 %v194_v12, %v1538_v17  ;;  %v207_v52 = vld [vmem:[#allocation2 + $0xe0] sm:$0xff]  ;;  %v204_v59 = vld [vmem:[#allocation2 + $0xc8] sm:$0xff]  ;;  %s1335_s16 = sshra.s32 %s1106_s18, 4  ;;  %s1341_s24 = scalar_lea.hbm %s2129_s2, 48  ;;  %s1336_s16 = int_to_ptr.hbm [resolvable:$true] %s1335_s16 }
  0x36   : > { %v274_v24 = vand.u32 4294901760, %v1536_v16  ;;  %v280_v27 = vand.u32 4294901760, %v1542_v18  ;;  %v286_v28 = vand.u32 4294901760, %v1545_v19  ;;  %390 = vmatpush.msra.mxu3 %v1518_v4  ;;  %v1574_v33 = vand.u32 4294901760, %v188_v21  ;;  %v178_v2 = vld [vmem:[%s1510_s6] sm:$0xff]  ;;  %s1337_s20 = scalar_lea.hbm %s1336_s16, 24  ;;  %p1342_p12 = scmp.lt.s32.totalorder %s1336_s16, %s2129_s2 }
  0x37   : > { %228 = vmatpush.msra.mxu0 %v1520_v5  ;;  %v263_v30 = vsub.f32 %v1530_v14, %v262_v22  ;;  %v269_v31 = vsub.f32 %v1533_v15, %v268_v23  ;;  %346 = vmatpush.msra.mxu2 %v1533_v15  ;;  %v292_v34 = vand.u32 4294901760, %v1548_v20  ;;  %v1577_v35 = vand.u32 4294901760, %v185_v26  ;;  %v192_v14 = vld [vmem:[#allocation2 + $0x68] sm:$0xff]  ;;  %p1338_p1 = scmp.ne.s32.totalorder %s1336_s16, %s1337_s20  ;;  %p1343_p8 = scmp.lt.s32.totalorder %s1341_s24, %s1337_s20 }
  0x38   : > { %v275_v32 = vsub.f32 %v1536_v16, %v274_v24  ;;  %392 = vmatpush.msra.mxu3 %v1520_v5  ;;  %v281_v39 = vsub.f32 %v1542_v18, %v280_v27  ;;  %v1586_v40 = vsub.f32 %v191_v13, %v1555_v25  ;;  %v287_v43 = vsub.f32 %v1545_v19, %v286_v28 }
  0x39   : > { %v264_v37 = vand.u32 4294901760, %v263_v30  ;;  %230 = vmatpush.msra.mxu0 %v1522_v9  ;;  %v270_v38 = vand.u32 4294901760, %v269_v31  ;;  %349 = vmatpush.msra.mxu2 %v1536_v16  ;;  %v298_v46 = vand.u32 4294901760, %v1560_v29  ;;  %v1594_v47 = vand.u32 4294901760, %v182_v36  ;;  %v186_v16 = vld [vmem:[#allocation2 + $0x38] sm:$0xff]  ;;  %p1339_p3 = pnand %p1338_p1, %p1471_p13  ;;  %p1344_p7 = por %p1343_p8, %p1342_p12 }
  0x3a   : > { %394 = vmatpush.msra.mxu3 %v1522_v9  ;;  %v276_v45 = vand.u32 4294901760, %v275_v32  ;;  %v1597_v48 = vsub.f32 %v188_v21, %v1574_v33  ;;  %v293_v49 = vsub.f32 %v1548_v20, %v292_v34  ;;  %v1604_v50 = vand.u32 4294901760, %v213_v41 }
  0x3b   : > { %265 = vmatpush.msra.mxu1 %v264_v37  ;;  %232 = vmatpush.msra.mxu0 %v1524_v10  ;;  %v1606_v51 = vand.u32 4294901760, %v210_v42  ;;  %v282_v53 = vand.u32 4294901760, %v281_v39  ;;  %v304_v54 = vand.u32 4294901760, %v1586_v40  ;;  %v1610_v55 = vand.u32 4294901760, %v179_v44  ;;  %p1340_p5 = pneg %p1339_p3 }
  0x3c   : > { %352 = vmatpush.msra.mxu2 %v1542_v18  ;;  %396 = vmatpush.msra.mxu3 %v1524_v10  ;;  %v1613_v56 = vsub.f32 %v185_v26, %v1577_v35  ;;  %v1617_v57 = vsub.f32 %v182_v36, %v1594_v47  ;;  %v1621_v58 = vsub.f32 %v213_v41, %v1604_v50  ;;  %v288_v60 = vand.u32 4294901760, %v287_v43 }
  0x3d   : > { %271 = vmatpush.msra.mxu1 %v270_v38  ;;  %234 = vmatpush.msra.mxu0 %v1526_v11  ;;  %v299_v61 = vsub.f32 %v1560_v29, %v298_v46  ;;  %v310_v62 = vand.u32 4294901760, %v1597_v48  ;;  %v1628_v63 = vand.u32 4294901760, %v207_v52  ;;  %v294_v0 = vand.u32 4294901760, %v293_v49  ;;  %v201_v38 = vld [vmem:[#allocation2 + $0xb0] sm:$0xff]  ;;  %v198_v49 = vld [vmem:[#allocation2 + $0x98] sm:$0xff]  ;;  %p1345_p9 = pnand %p1344_p7, %p1340_p5 }
  0x3e   : > { %355 = vmatpush.msra.mxu2 %v1545_v19  ;;  %398 = vmatpush.msra.mxu3 %v1526_v11  ;;  %v1633_v1 = vsub.f32 %v210_v42, %v1606_v51  ;;  %v305_v6 = vsub.f32 %v1586_v40, %v304_v54  ;;  %v316_v7 = vand.u32 4294901760, %v1613_v56  ;;  %v1642_v8 = vsub.f32 %v179_v44, %v1610_v55 }
  0x3f   : > { %277 = vmatpush.msra.mxu1 %v276_v45  ;;  %236 = vmatpush.msra.mxu0 %v1538_v17  ;;  %v1644_v12 = vand.u32 4294901760, %v204_v59  ;;  %v322_v13 = vand.u32 4294901760, %v1617_v57  ;;  %v2131_v21 = vand.u32 4294901760, %v1621_v58  ;;  %v300_v26 = vand.u32 4294901760, %v299_v61 }
  0x40   : > { %358 = vmatpush.msra.mxu2 %v1548_v20  ;;  %400 = vmatpush.msra.mxu3 %v1538_v17  ;;  %v311_v30 = vsub.f32 %v1597_v48, %v310_v62  ;;  %v1655_v31 = vsub.f32 %v207_v52, %v1628_v63  ;;  %v217_v32 = vsel %vm215_vm0, %v178_v2, 0  ;;  %v2130_v36 = vand.u32 4294901760, %v1633_v1 }
  0x41   : > { %283 = vmatpush.msra.mxu1 %v282_v53  ;;  %238 = vmatpush.msra.mxu0 %v1555_v25  ;;  %v1660_v37 = vand.u32 4294901760, %v217_v32  ;;  %v306_v39 = vand.u32 4294901760, %v305_v6  ;;  %v317_v41 = vsub.f32 %v1613_v56, %v316_v7  ;;  %v2132_v42 = vand.u32 4294901760, %v1642_v8 }
  0x42   : > { %361 = vmatpush.msra.mxu2 %v1560_v29  ;;  %402 = vmatpush.msra.mxu3 %v1555_v25  ;;  %v1668_v43 = vsub.f32 %v204_v59, %v1644_v12  ;;  %v323_v44 = vsub.f32 %v1617_v57, %v322_v13  ;;  %v552_v45 = vsub.f32 %v1621_v58, %v2131_v21  ;;  %v312_v52 = vand.u32 4294901760, %v311_v30 }
  0x43   : > { %289 = vmatpush.msra.mxu1 %v288_v60  ;;  %240 = vmatpush.msra.mxu0 %v1574_v33  ;;  %v563_v53 = vand.u32 4294901760, %v1655_v31  ;;  %v1681_v59 = vsub.f32 %v217_v32, %v1660_v37  ;;  %v1683_v60 = vand.u32 4294901760, %v201_v38  ;;  %v558_v61 = vsub.f32 %v1633_v1, %v2130_v36 }
  0x44   : > { %364 = vmatpush.msra.mxu2 %v1586_v40  ;;  %404 = vmatpush.msra.mxu3 %v1574_v33  ;;  %v318_v2 = vand.u32 4294901760, %v317_v41  ;;  %v329_v6 = vsub.f32 %v1642_v8, %v2132_v42  ;;  %v1695_v30 = vand.u32 4294901760, %v198_v49  ;;  %v324_v32 = vand.u32 4294901760, %v323_v44 }
  0x45   : > { %295 = vmatpush.msra.mxu1 %v294_v0  ;;  %242 = vmatpush.msra.mxu0 %v1577_v35  ;;  %v195_v0 = vld [vmem:[#allocation2 + $0x80] sm:$0xff]  ;;  %v553_v36 = vand.u32 4294901760, %v552_v45  ;;  %v1705_v41 = vand.u32 4294901760, %v1681_v59  ;;  %v1708_v21 = vsub.f32 %v201_v38, %v1683_v60  ;;  %v1724_v15 = vand.u32 4294901760, %v192_v14 }
  0x46   : > { %367 = vmatpush.msra.mxu2 %v1597_v48  ;;  %406 = vmatpush.msra.mxu3 %v1577_v35  ;;  %v1710_v42 = vand.u32 4294901760, %v195_v0  ;;  %v330_v44 = vand.u32 4294901760, %v329_v6  ;;  %v1720_v38 = vsub.f32 %v198_v49, %v1695_v30 }
  0x47   : > { %301 = vmatpush.msra.mxu1 %v300_v26  ;;  %244 = vmatpush.msra.mxu0 %v1594_v47  ;;  %v569_v26 = vand.u32 4294901760, %v1668_v43 }
  0x48   : > { %370 = vmatpush.msra.mxu2 %v1613_v56  ;;  %408 = vmatpush.msra.mxu3 %v1594_v47  ;;  %v1731_v6 = vsub.f32 %v195_v0, %v1710_v42  ;;  %v1743_v0 = vsub.f32 %v192_v14, %v1724_v15  ;;  %v180_v14 = vld [vmem:[#allocation2 + $0x8] sm:$0xff] }
  0x49   : > { %307 = vmatpush.msra.mxu1 %v306_v39  ;;  %246 = vmatpush.msra.mxu0 %v1610_v55  ;;  %v564_v39 = vsub.f32 %v1655_v31, %v563_v53  ;;  %v570_v45 = vsub.f32 %v1668_v43, %v569_v26 }
  0x4a   : > { %373 = vmatpush.msra.mxu2 %v1617_v57  ;;  %410 = vmatpush.msra.mxu3 %v1610_v55 }
  0x4b   : > { %425 = vmatpush.msrb.mxu0 %v262_v22  ;;  %313 = vmatpush.msra.mxu1 %v312_v52  ;;  %v559_v22 = vand.u32 4294901760, %v558_v61  ;;  %v565_v52 = vand.u32 4294901760, %v564_v39  ;;  %v250_v61 = vsub.f32 %v1681_v59, %v1705_v41  ;;  %v1752_v39 = vand.u32 4294901760, %v186_v16 }
  0x4c   : > { %376 = vmatpush.msra.mxu2 %v1642_v8  ;;  %554 = vmatpush.msrb.mxu3 %v553_v36  ;;  %v581_v36 = vand.u32 4294901760, %v1720_v38 }
  0x4d   : > { %429 = vmatpush.msrb.mxu0 %v268_v23  ;;  %319 = vmatpush.msra.mxu1 %v318_v2  ;;  %v189_v23 = vld [vmem:[#allocation2 + $0x50] sm:$0xff]  ;;  %v575_v2 = vand.u32 4294901760, %v1708_v21  ;;  %v1746_v18 = vand.u32 4294901760, %v250_v61  ;;  %v208_v61 = vld [vmem:[#allocation2 + $0xe8] sm:$0xff] }
  0x4e   : > { %513 = vmatpush.msrb.mxu2 %v1604_v50  ;;  %560 = vmatpush.msrb.mxu3 %v559_v22  ;;  %v1737_v49 = vand.u32 4294901760, %v189_v23  ;;  %v582_v19 = vsub.f32 %v1720_v38, %v581_v36 }
  0x4f   : > { %433 = vmatpush.msrb.mxu0 %v274_v24  ;;  %325 = vmatpush.msra.mxu1 %v324_v32  ;;  %v571_v24 = vand.u32 4294901760, %v570_v45  ;;  %v587_v32 = vand.u32 4294901760, %v1731_v6 }
  0x50   : > { %515 = vmatpush.msrb.mxu2 %v1606_v51  ;;  %566 = vmatpush.msrb.mxu3 %v565_v52  ;;  %v583_v29 = vand.u32 4294901760, %v582_v19  ;;  %v2139_v52 = vand.u32 4294901760, %v1621_v58  ;;  %v196_v19 = vld [vmem:[#allocation2 + $0x88] sm:$0xff] }
  0x51   : > { %437 = vmatpush.msrb.mxu0 %v280_v27  ;;  %331 = vmatpush.msra.mxu1 %v330_v44  ;;  %v576_v27 = vsub.f32 %v1708_v21, %v575_v2  ;;  %v588_v22 = vsub.f32 %v1731_v6, %v587_v32  ;;  %v1776_v44 = vsub.f32 %v186_v16, %v1752_v39  ;;  %v2140_v16 = vand.u32 4294901760, %v1633_v1 }
  0x52   : > { %517 = vmatpush.msrb.mxu2 %v1628_v63  ;;  %572 = vmatpush.msrb.mxu3 %v571_v24 }
  0x53   : > { %480 = vmatpush.msrb.mxu1 %v1516_v3  ;;  %441 = vmatpush.msrb.mxu0 %v286_v28  ;;  %v183_v3 = vld [vmem:[#allocation2 + $0x20] sm:$0xff]  ;;  %v1762_v28 = vsub.f32 %v189_v23, %v1737_v49  ;;  %v605_v45 = vand.u32 4294901760, %v1776_v44  ;;  %v214_v23 = vld [vmem:[#allocation2 + $0x118] sm:$0xff] }
  0x54   : > { %519 = vmatpush.msrb.mxu2 %v1644_v12  ;;  %v1768_v20 = vand.u32 4294901760, %v183_v3  ;;  %252 = vmatmul.f32.vlgmr.msra.gmra.mxu0 %v1746_v18 }
  0x55   : > { %482 = vmatpush.msrb.mxu1 %v1518_v4  ;;  %445 = vmatpush.msrb.mxu0 %v292_v34  ;;  %v593_v4 = vand.u32 4294901760, %v1743_v0  ;;  %v577_v34 = vand.u32 4294901760, %v576_v27  ;;  %v606_v56 = vsub.f32 %v1776_v44, %v605_v45  ;;  %v205_v27 = vld [vmem:[#allocation2 + $0xd0] sm:$0xff] }
  0x56   : > { %379 = vmatmul.f32.vlgmr.msra.gmra.mxu2 %v1681_v59  ;;  %414 = vmatmul.f32.vlgmr.msra.gmra.mxu3 %v1705_v41  ;;  %v1793_v40 = vsub.f32 %v183_v3, %v1768_v20 }
  0x57   : > { %484 = vmatpush.msrb.mxu1 %v1520_v5  ;;  %449 = vmatpush.msrb.mxu0 %v298_v46  ;;  %v1781_v5 = vand.u32 4294901760, %v180_v14  ;;  %v599_v46 = vand.u32 4294901760, %v1762_v28 }
  0x58   : > { %521 = vmatpush.msrb.mxu2 %v1683_v60  ;;  %578 = vmatpush.msrb.mxu3 %v577_v34 }
  0x59   : > { %486 = vmatpush.msrb.mxu1 %v1522_v9  ;;  %453 = vmatpush.msrb.mxu0 %v304_v54  ;;  %v594_v9 = vsub.f32 %v1743_v0, %v593_v4  ;;  %v589_v54 = vand.u32 4294901760, %v588_v22  ;;  %v600_v48 = vsub.f32 %v1762_v28, %v599_v46  ;;  %v190_v22 = vld [vmem:[#allocation2 + $0x58] sm:$0xff] }
  0x5a   : > { %523 = vmatpush.msrb.mxu2 %v1695_v30  ;;  %333 = vmatmul.f32.vlgmr.msra.gmra.mxu1 %v1660_v37 }
  0x5b   : > { %488 = vmatpush.msrb.mxu1 %v1524_v10  ;;  %457 = vmatpush.msrb.mxu0 %v310_v62  ;;  %v1801_v10 = vsub.f32 %v180_v14, %v1781_v5  ;;  %v595_v62 = vand.u32 4294901760, %v594_v9  ;;  %v601_v57 = vand.u32 4294901760, %v600_v48  ;;  %v193_v14 = vld [vmem:[#allocation2 + $0x70] sm:$0xff]  ;;  %v187_v9 = vld [vmem:[#allocation2 + $0x40] sm:$0xff] }
  0x5c   : > { %525 = vmatpush.msrb.mxu2 %v1710_v42  ;;  %584 = vmatpush.msrb.mxu3 %v583_v29 }
  0x5d   : > { %490 = vmatpush.msrb.mxu1 %v1526_v11  ;;  %461 = vmatpush.msrb.mxu0 %v316_v7  ;;  %v611_v11 = vand.u32 4294901760, %v1793_v40  ;;  %v2138_v7 = vand.u32 4294901760, %v1642_v8 }
  0x5e   : > { %527 = vmatpush.msrb.mxu2 %v1724_v15  ;;  %590 = vmatpush.msrb.mxu3 %v589_v54  ;;  %v1933_v54 = vand.u32 4294901760, %v190_v22 }
  0x5f   : > { %492 = vmatpush.msrb.mxu1 %v1538_v17  ;;  %465 = vmatpush.msrb.mxu0 %v322_v13  ;;  %v617_v17 = vand.u32 4294901760, %v1801_v10  ;;  %v612_v13 = vsub.f32 %v1793_v40, %v611_v11 }
  0x60   : > { %529 = vmatpush.msrb.mxu2 %v1737_v49  ;;  %596 = vmatpush.msrb.mxu3 %v595_v62  ;;  %v184_v62 = vld [vmem:[#allocation2 + $0x28] sm:$0xff] }
  0x61   : > { %494 = vmatpush.msrb.mxu1 %v1555_v25  ;;  %469 = vmatpush.msrb.mxu0 %v2138_v7  ;;  %v607_v25 = vand.u32 4294901760, %v606_v56  ;;  %v618_v8 = vsub.f32 %v1801_v10, %v617_v17  ;;  %v1947_v56 = vand.u32 4294901760, %v187_v9 }
  0x62   : > { %531 = vmatpush.msrb.mxu2 %v1752_v39  ;;  %471 = vmatmul.f32.vlgmr.msrb.gmra.mxu0 %v1660_v37 }
  0x63   : > { %632 = vmatpush.msra.mxu0 %v1621_v58  ;;  %496 = vmatpush.msrb.mxu1 %v1574_v33  ;;  %v613_v33 = vand.u32 4294901760, %v612_v13  ;;  %v1856_v58 = vand.u32 4294901760, %v208_v61  ;;  %v1959_v13 = vand.u32 4294901760, %v184_v62 }
  0x64   : > { %602 = vmatpush.msrb.mxu3 %v601_v57  ;;  %533 = vmatpush.msrb.mxu2 %v1768_v20  ;;  %v181_v57 = vld [vmem:[#allocation2 + $0x10] sm:$0xff] }
  0x65   : > { %635 = vmatpush.msra.mxu0 %v1633_v1  ;;  %498 = vmatpush.msrb.mxu1 %v1577_v35  ;;  %v619_v35 = vand.u32 4294901760, %v618_v8  ;;  %v202_v1 = vld [vmem:[#allocation2 + $0xb8] sm:$0xff] }
  0x66   : > { %608 = vmatpush.msrb.mxu3 %v607_v25  ;;  %535 = vmatpush.msrb.mxu2 %v1781_v5  ;;  %v1962_v25 = vsub.f32 %v190_v22, %v1933_v54 }
  0x67   : > { %638 = vmatpush.msra.mxu0 %v1655_v31  ;;  %500 = vmatpush.msrb.mxu1 %v1594_v47  ;;  %v211_v47 = vld [vmem:[#allocation2 + $0x100] sm:$0xff] }
  0x68   : > { %614 = vmatpush.msrb.mxu3 %v613_v33  ;;  %714 = vmatpush.msra.mxu2 %v2139_v52  ;;  %v1852_v24 = vand.u32 4294901760, %v211_v47 }
  0x69   : > { %641 = vmatpush.msra.mxu0 %v1668_v43  ;;  %502 = vmatpush.msrb.mxu1 %v1610_v55  ;;  %v1845_v55 = vand.u32 4294901760, %v214_v23 }
  0x6a   : > { %504 = vmatmul.f32.vlgmr.msrb.gmra.mxu1 %v1660_v37  ;;  %620 = vmatpush.msrb.mxu3 %v619_v35  ;;  %v1872_v31 = vsub.f32 %v211_v47, %v1852_v24  ;;  %v1972_v35 = vand.u32 4294901760, %v181_v57  ;;  %v1986_v47 = vsub.f32 %v184_v62, %v1959_v13 }
  0x6b   : > { %677 = vmatpush.msra.mxu1 %v1604_v50  ;;  %644 = vmatpush.msra.mxu0 %v1708_v21  ;;  %v1862_v3 = vsub.f32 %v214_v23, %v1845_v55  ;;  %v1975_v23 = vsub.f32 %v187_v9, %v1947_v56 }
  0x6c   : > { %718 = vmatpush.msra.mxu2 %v2140_v16  ;;  %769 = vmatpush.msra.mxu3 %v1604_v50  ;;  %v1866_v50 = vand.u32 4294901760, %v205_v27  ;;  %v846_v21 = vand.u32 4294901760, %v1872_v31  ;;  %v1996_v52 = vsub.f32 %v181_v57, %v1972_v35  ;;  %v900_v16 = vand.u32 4294901760, %v1986_v47 }
  0x6d   : > { %679 = vmatpush.msra.mxu1 %v1606_v51  ;;  %647 = vmatpush.msra.mxu0 %v1720_v38  ;;  %v840_v43 = vand.u32 4294901760, %v1862_v3  ;;  %v1905_v38 = vand.u32 4294901760, %v196_v19 }
  0x6e   : > { %722 = vmatpush.msra.mxu2 %v563_v53  ;;  %771 = vmatpush.msra.mxu3 %v1606_v51  ;;  %v1877_v51 = vsub.f32 %v208_v61, %v1856_v58  ;;  %v199_v53 = vld [vmem:[#allocation2 + $0xa0] sm:$0xff] }
  0x6f   : > { %681 = vmatpush.msra.mxu1 %v1628_v63  ;;  %650 = vmatpush.msra.mxu0 %v1731_v6  ;;  %v847_v6 = vsub.f32 %v1872_v31, %v846_v21  ;;  %v1936_v48 = vsub.f32 %v196_v19, %v1905_v38 }
  0x70   : > { %726 = vmatpush.msra.mxu2 %v569_v26  ;;  %773 = vmatpush.msra.mxu3 %v1628_v63  ;;  %v1883_v26 = vand.u32 4294901760, %v202_v1  ;;  %v1888_v63 = vsub.f32 %v205_v27, %v1866_v50 }
  0x71   : > { %683 = vmatpush.msra.mxu1 %v1644_v12  ;;  %653 = vmatpush.msra.mxu0 %v1743_v0 }
  0x72   : > { %730 = vmatpush.msra.mxu2 %v575_v2  ;;  %775 = vmatpush.msra.mxu3 %v1644_v12  ;;  %v1894_v12 = vand.u32 4294901760, %v199_v53  ;;  %v852_v2 = vand.u32 4294901760, %v1877_v51  ;;  %v858_v34 = vand.u32 4294901760, %v1888_v63 }
  0x73   : > { %685 = vmatpush.msra.mxu1 %v1683_v60  ;;  %656 = vmatpush.msra.mxu0 %v1762_v28  ;;  %v848_v28 = vand.u32 4294901760, %v847_v6 }
  0x74   : > { %734 = vmatpush.msra.mxu2 %v581_v36  ;;  %777 = vmatpush.msra.mxu3 %v1683_v60  ;;  %v841_v60 = vsub.f32 %v1862_v3, %v840_v43  ;;  %v1908_v36 = vsub.f32 %v202_v1, %v1883_v26  ;;  %v1922_v29 = vsub.f32 %v199_v53, %v1894_v12  ;;  %v906_v53 = vand.u32 4294901760, %v1996_v52 }
  0x75   : > { %687 = vmatpush.msra.mxu1 %v1695_v30  ;;  %659 = vmatpush.msra.mxu0 %v1776_v44 }
  0x76   : > { %738 = vmatpush.msra.mxu2 %v587_v32  ;;  %779 = vmatpush.msra.mxu3 %v1695_v30  ;;  %v1919_v32 = vand.u32 4294901760, %v193_v14  ;;  %v853_v30 = vsub.f32 %v1877_v51, %v852_v2  ;;  %v842_v0 = vand.u32 4294901760, %v841_v60  ;;  %v907_v22 = vsub.f32 %v1996_v52, %v906_v53 }
  0x77   : > { %689 = vmatpush.msra.mxu1 %v1710_v42  ;;  %662 = vmatpush.msra.mxu0 %v1793_v40 }
  0x78   : > { %742 = vmatpush.msra.mxu2 %v593_v4  ;;  %781 = vmatpush.msra.mxu3 %v1710_v42  ;;  %v864_v4 = vand.u32 4294901760, %v1908_v36  ;;  %v859_v42 = vsub.f32 %v1888_v63, %v858_v34  ;;  %v1950_v7 = vsub.f32 %v193_v14, %v1919_v32  ;;  %v901_v14 = vsub.f32 %v1986_v47, %v900_v16 }
  0x79   : > { %691 = vmatpush.msra.mxu1 %v1724_v15  ;;  %665 = vmatpush.msra.mxu0 %v1801_v10 }
  0x7a   : > { %746 = vmatpush.msra.mxu2 %v599_v46  ;;  %783 = vmatpush.msra.mxu3 %v1724_v15  ;;  %v870_v46 = vand.u32 4294901760, %v1922_v29  ;;  %v854_v15 = vand.u32 4294901760, %v853_v30  ;;  %v865_v44 = vsub.f32 %v1908_v36, %v864_v4  ;;  %v882_v33 = vand.u32 4294901760, %v1950_v7 }
  0x7b   : > { %802 = vmatpush.msrb.mxu0 %v1845_v55  ;;  %693 = vmatpush.msra.mxu1 %v1737_v49  ;;  %v902_v6 = vand.u32 4294901760, %v901_v14  ;;  %v908_v30 = vand.u32 4294901760, %v907_v22 }
  0x7c   : > { %750 = vmatpush.msra.mxu2 %v605_v45  ;;  %785 = vmatpush.msra.mxu3 %v1737_v49  ;;  %v876_v45 = vand.u32 4294901760, %v1936_v48  ;;  %v860_v49 = vand.u32 4294901760, %v859_v42  ;;  %v871_v8 = vsub.f32 %v1922_v29, %v870_v46  ;;  %v883_v10 = vsub.f32 %v1950_v7, %v882_v33 }
  0x7d   : > { %804 = vmatpush.msrb.mxu0 %v1852_v24  ;;  %695 = vmatpush.msra.mxu1 %v1752_v39 }
  0x7e   : > { %754 = vmatpush.msra.mxu2 %v611_v11  ;;  %787 = vmatpush.msra.mxu3 %v1752_v39  ;;  %v866_v39 = vand.u32 4294901760, %v865_v44  ;;  %v877_v40 = vsub.f32 %v1936_v48, %v876_v45  ;;  %v888_v11 = vand.u32 4294901760, %v1962_v25  ;;  %v884_v27 = vand.u32 4294901760, %v883_v10 }
  0x7f   : > { %806 = vmatpush.msrb.mxu0 %v1856_v58  ;;  %697 = vmatpush.msra.mxu1 %v1768_v20 }
  0x80   : > { %758 = vmatpush.msra.mxu2 %v617_v17  ;;  %789 = vmatpush.msra.mxu3 %v1768_v20  ;;  %v872_v20 = vand.u32 4294901760, %v871_v8  ;;  %v894_v17 = vand.u32 4294901760, %v1975_v23  ;;  %v889_v61 = vsub.f32 %v1962_v25, %v888_v11 }
  0x81   : > { %808 = vmatpush.msrb.mxu0 %v1866_v50  ;;  %699 = vmatpush.msra.mxu1 %v1781_v5 }
  0x82   : > { %541 = vmatmul.f32.vlgmr.msrb.gmra.mxu2 %v1746_v18  ;;  %791 = vmatpush.msra.mxu3 %v1781_v5  ;;  %v878_v5 = vand.u32 4294901760, %v877_v40  ;;  %v895_v1 = vsub.f32 %v1975_v23, %v894_v17  ;;  %v890_v19 = vand.u32 4294901760, %v889_v61 }
  0x83   : > { %843 = vmatpush.msrb.mxu1 %v842_v0  ;;  %810 = vmatpush.msrb.mxu0 %v1883_v26 }
  0x84   : > { %921 = vmatpush.msrb.mxu2 %v1862_v3  ;;  %622 = vmatmul.f32.vlgmr.msrb.gmra.mxu3 %v1660_v37  ;;  %v896_v60 = vand.u32 4294901760, %v895_v1 }
  0x85   : > { %849 = vmatpush.msrb.mxu1 %v848_v28  ;;  %812 = vmatpush.msrb.mxu0 %v1894_v12 }
  0x86   : > { %924 = vmatpush.msrb.mxu2 %v1872_v31  ;;  %966 = vmatpush.msrb.mxu3 %v1845_v55 }
  0x87   : > { %855 = vmatpush.msrb.mxu1 %v854_v15  ;;  %814 = vmatpush.msrb.mxu0 %v1905_v38 }
  0x88   : > { %927 = vmatpush.msrb.mxu2 %v1877_v51  ;;  %968 = vmatpush.msrb.mxu3 %v1852_v24 }
  0x89   : > { %861 = vmatpush.msrb.mxu1 %v860_v49  ;;  %816 = vmatpush.msrb.mxu0 %v1919_v32 }
  0x8a   : > { %930 = vmatpush.msrb.mxu2 %v1888_v63  ;;  %970 = vmatpush.msrb.mxu3 %v1856_v58 }
  0x8b   : > { %867 = vmatpush.msrb.mxu1 %v866_v39  ;;  %818 = vmatpush.msrb.mxu0 %v1933_v54 }
  0x8c   : > { %760 = vmatmul.f32.vlgmr.msra.gmra.mxu2 %v1660_v37  ;;  %972 = vmatpush.msrb.mxu3 %v1866_v50 }
  0x8d   : > { %873 = vmatpush.msrb.mxu1 %v872_v20  ;;  %820 = vmatpush.msrb.mxu0 %v1947_v56 }
  0x8e   : > { %933 = vmatpush.msrb.mxu2 %v1908_v36  ;;  %668 = vmatmul.f32.vlgmr.msra.gmra.mxu0 %v1681_v59 }
  0x8f   : > { %879 = vmatpush.msrb.mxu1 %v878_v5  ;;  %822 = vmatpush.msrb.mxu0 %v1959_v13 }
  0x90   : > { %793 = vmatmul.f32.vlgmr.msra.gmra.mxu3 %v1660_v37  ;;  %936 = vmatpush.msrb.mxu2 %v1922_v29 }
  0x91   : > { %885 = vmatpush.msrb.mxu1 %v884_v27  ;;  %824 = vmatpush.msrb.mxu0 %v1972_v35 }
  0x92   : > { %974 = vmatpush.msrb.mxu3 %v1883_v26  ;;  %939 = vmatpush.msrb.mxu2 %v1936_v48 }
  0x93   : > { %891 = vmatpush.msrb.mxu1 %v890_v19  ;;  %1003 = vmatpush.msra.mxu0 %v840_v43 }
  0x94   : > { %703 = vmatmul.f32.vlgmr.msra.gmra.mxu1 %v1705_v41  ;;  %976 = vmatpush.msrb.mxu3 %v1894_v12 }
  0x95   : > { %897 = vmatpush.msrb.mxu1 %v896_v60  ;;  %1007 = vmatpush.msra.mxu0 %v846_v21 }
  0x96   : > { %942 = vmatpush.msrb.mxu2 %v1950_v7  ;;  %978 = vmatpush.msrb.mxu3 %v1905_v38 }
  0x97   : > { %903 = vmatpush.msrb.mxu1 %v902_v6  ;;  %1011 = vmatpush.msra.mxu0 %v852_v2 }
  0x98   : > { %945 = vmatpush.msrb.mxu2 %v1962_v25  ;;  %980 = vmatpush.msrb.mxu3 %v1919_v32 }
  0x99   : > { %909 = vmatpush.msrb.mxu1 %v908_v30  ;;  %1015 = vmatpush.msra.mxu0 %v858_v34 }
  0x9a   : > { %948 = vmatpush.msrb.mxu2 %v1975_v23  ;;  %982 = vmatpush.msrb.mxu3 %v1933_v54 }
  0x9b   : > { %1058 = vmatpush.msra.mxu1 %v1845_v55  ;;  %1019 = vmatpush.msra.mxu0 %v864_v4 }
  0x9c   : > { %951 = vmatpush.msrb.mxu2 %v1986_v47  ;;  %984 = vmatpush.msrb.mxu3 %v1947_v56 }
  0x9d   : > { %1060 = vmatpush.msra.mxu1 %v1852_v24  ;;  %1023 = vmatpush.msra.mxu0 %v870_v46 }
  0x9e   : > { %954 = vmatpush.msrb.mxu2 %v1996_v52  ;;  %986 = vmatpush.msrb.mxu3 %v1959_v13 }
  0x9f   : > { %1062 = vmatpush.msra.mxu1 %v1856_v58  ;;  %1027 = vmatpush.msra.mxu0 %v876_v45 }
  0xa0   : > { %957 = vmatmul.f32.vlgmr.msrb.gmra.mxu2 %v1681_v59  ;;  %988 = vmatpush.msrb.mxu3 %v1972_v35 }
  0xa1   : > { %1064 = vmatpush.msra.mxu1 %v1866_v50  ;;  %1031 = vmatpush.msra.mxu0 %v882_v33 }
  0xa2   : > { %830 = vmatmul.f32.vlgmr.msrb.gmra.mxu0 %v1746_v18  ;;  %992 = vmatmul.f32.vlgmr.msrb.gmra.mxu3 %v1705_v41 }
  0xa3   : > { %1066 = vmatpush.msra.mxu1 %v1883_v26  ;;  %1035 = vmatpush.msra.mxu0 %v888_v11 }
  0xa4   : > { %911 = vmatmul.f32.vlgmr.msrb.gmra.mxu1 %v1660_v37 }
  0xa5   : > { %1068 = vmatpush.msra.mxu1 %v1894_v12  ;;  %1039 = vmatpush.msra.mxu0 %v894_v17 }
  0xa7   : > { %1070 = vmatpush.msra.mxu1 %v1905_v38  ;;  %1043 = vmatpush.msra.mxu0 %v900_v16 }
  0xa9   : > { %1072 = vmatpush.msra.mxu1 %v1919_v32  ;;  %1047 = vmatpush.msra.mxu0 %v906_v53 }
  0xaa   : > { %1049 = vmatmul.f32.vlgmr.msra.gmra.mxu0 %v1660_v37 }
  0xab   : > { %1074 = vmatpush.msra.mxu1 %v1933_v54 }
  0xad   : > { %1076 = vmatpush.msra.mxu1 %v1947_v56 }
  0xaf   : > { %1078 = vmatpush.msra.mxu1 %v1959_v13 }
  0xb1   : > { %1080 = vmatpush.msra.mxu1 %v1972_v35 }
  0xb2   : > { %1082 = vmatmul.f32.vlgmr.msra.gmra.mxu1 %v1660_v37 }
  0xd1   : > { %v253_v59 = vpop.f32.mrf.mxu0 }
  0xd7   : > { %v334_v41 = vpop.f32.mrf.mxu1 }
  0xd8   : > { %v335_v18 = vadd.f32 %v334_v41, %v253_v59 }
  0xd9   : > { %v380_v55 = vpop.f32.mrf.mxu2  ;;  %v415_v58 = vpop.f32.mrf.mxu3 }
  0xda   : > { %v381_v24 = vadd.f32 %v380_v55, %v335_v18 }
  0xdc   : > { %v416_v3 = vadd.f32 %v415_v58, %v381_v24 }
  0xdf   : > { %v472_v50 = vpop.f32.mrf.mxu0 }
  0xe0   : > { %v473_v31 = vadd.f32 %v472_v50, %v416_v3 }
  0xe7   : > { %v505_v51 = vpop.f32.mrf.mxu1 }
  0xe8   : > { %v506_v43 = vadd.f32 %v505_v51, %v473_v31 }
  0xea   : > { %1086 = vst [vmem:[%s2088_s27] sm:$0xff] %v506_v43 }
 0x105   : > { %v542_v26 = vpop.f32.mrf.mxu2 }
 0x107   : > { %v623_v37 = vpop.f32.mrf.mxu3 }
 0x108   : > { %v624_v63 = vadd.f32 %v623_v37, %v542_v26 }
 0x10b   : > { %v669_v21 = vpop.f32.mrf.mxu0 }
 0x10c   : > { %v670_v12 = vadd.f32 %v669_v21, %v624_v63 }
 0x10f   : > { %v761_v38 = vpop.f32.mrf.mxu2 }
 0x111   : > { %v704_v2 = vpop.f32.mrf.mxu1 }
 0x112   : > { %v705_v36 = vadd.f32 %v704_v2, %v670_v12 }
 0x113   : > { %v794_v34 = vpop.f32.mrf.mxu3 }
 0x114   : > { %v762_v32 = vadd.f32 %v761_v38, %v705_v36 }
 0x116   : > { %v795_v29 = vadd.f32 %v794_v34, %v762_v32 }
 0x118   : > { %1087 = vst [vmem:[%s2088_s27 + $0x8] sm:$0xff] %v795_v29 }
 0x11f   : > { %v831_v9 = vpop.f32.mrf.mxu0 }
 0x121   : > { %v912_v0 = vpop.f32.mrf.mxu1 }
 0x122   : > { %v913_v4 = vadd.f32 %v912_v0, %v831_v9 }
 0x123   : > { %v958_v54 = vpop.f32.mrf.mxu2 }
 0x124   : > { %v959_v48 = vadd.f32 %v958_v54, %v913_v4 }
 0x125   : > { %v993_v42 = vpop.f32.mrf.mxu3 }
 0x126   : > { %v994_v62 = vadd.f32 %v993_v42, %v959_v48 }
 0x127   : > { %v1050_v28 = vpop.f32.mrf.mxu0 }
 0x128   : > { %v1051_v46 = vadd.f32 %v1050_v28, %v994_v62 }
 0x12f   : > { %v1083_v56 = vpop.f32.mrf.mxu1 }
 0x130   : > { %v1084_v7 = vadd.f32 %v1083_v56, %v1051_v46 }
 0x132   : > { %1088 = vst [vmem:[%s2088_s27 + $0x10] sm:$0xff] %v1084_v7 }
 0x133   : > { %1348 = shalt.err (!%p1345_p9)
}
 0x134   : > { %1208 = dma.vmem_to_hbm [thread:$0]  (%p1471_p13), %s1104_s15, 384, %s1106_s18, %s1090_s19  }
 0x135 PF: > { %s1117_s29 = sand.u32 1, %s1379_s9   ;;  %p2141_p10 = scmp.ge.s32.totalorder %s1391_s12, 2 }
 0x136   : > { %s1118_s4 = scalar_lea.sflag [#allocation4], %s1117_s29 }
 0x137   : > { %p1219_p11 = pnand %p2141_p10, %p1476_p4 }
 0x139   : > { %p1220_p0 = pneg %p1219_p11 }
 0x13b   : > { %1374 = dma.done.wait (%p1220_p0), %s1118_s4, 384  }
 0x13c   : > { %1376 = vsyncadd (%p1220_p0), %s1118_s4, 4294966912  ;;  %p16_p2 = scmp.ge.s32.totalorder %s1451_s23, 4   ;;  %s2142_s9 = smov %s1383_s10 }
 0x13d   : > { %s2143_s10 = smov %s1387_s11  ;;  %s2144_s11 = smov %s1463_s26 }
 0x13e   : > { %s2145_s12 = smov %s1451_s23  ;;  %18 = sbr.rel (!%p16_p2) target bundleno = 6 (0x6), region = 78 }
 0x143   :  { %1124 = vsyncpa [#allocation3], 1 }
 0x144   :  { %1126 = vsyncpa [#allocation3 + $0x1], 1 }
 0x145   :  { %1127 = vsyncpa [#allocation6], 1 }
 0x146   :  { %1129 = vsyncpa [#allocation6 + $0x1], 1 }
 0x147   :  { %1130 = vsyncpa [#allocation4], 1 }
 0x148   :  { %1132 = vsyncpa [#allocation4 + $0x1], 1 }

</bundles_post_ra>
